<compile_context>
chip_gen: v6e
topology: v6e:2x2x1
jax: 0.10.0
libtpu: 0.0.40
codegen_flags: <defaults>
</compile_context>

<pallas_src>
import jax
import jax.numpy as jnp
from jax.experimental import pallas as pl
from jax.experimental.pallas import tpu as pltpu


def _embedding_layer_kernel(x_idx_ref, x_num_ref, tsplit_ref, cat_bias_ref,
                            num_w_ref, num_b_ref, out_ref):
    tb, f_cat = x_idx_ref.shape
    _, e_pad, d = tsplit_ref.shape

    # ---- categorical path: exact on-chip gather -----------------------------
    # bf16 one-hot (lane-dense: e_pad % 128 == 0) against the 3-way bf16 split
    # of the f32 table; three DEFAULT-precision MXU passes accumulated in f32.
    # TODO(synk): out-of-range / negative indices yield an all-zero one-hot row
    #             (result silently becomes cat_bias) instead of raising like
    #             torch.nn.Embedding.
    idx = x_idx_ref[...]                                              # (TB, F_cat) i32
    iota = jax.lax.broadcasted_iota(jnp.int32, (tb, f_cat, e_pad), 2)
    one_hot = (idx[:, :, None] == iota).astype(jnp.bfloat16)          # (TB, F_cat, E_pad)
    oh2 = one_hot.reshape(tb * f_cat, e_pad)                          # layout-preserving merge
    g = jnp.dot(oh2, tsplit_ref[0], preferred_element_type=jnp.float32)
    g = g + jnp.dot(oh2, tsplit_ref[1], preferred_element_type=jnp.float32)
    g = g + jnp.dot(oh2, tsplit_ref[2], preferred_element_type=jnp.float32)
    cat_out = g.reshape(tb, f_cat, d) + cat_bias_ref[...][None]       # (TB, F_cat, D)

    # ---- numeric path: per-feature scale + bias (pure VPU) ------------------
    num_out = (num_w_ref[...][None, :, :] * x_num_ref[...][:, :, None]
               + num_b_ref[...][None, :, :])                          # (TB, F_num, D)

    # ---- fused "concat": write both parts into one dense output block -------
    # TODO(synk): f_tot=12 makes the second write a 4-of-8 masked sublane store;
    #             padding f_tot to 16 + slicing after the flatten would add ~33%
    #             HBM writes plus an extra XLA copy (net loss standalone) -
    #             revisit if fused with a downstream (bf16) consumer.
    out_ref[:, :f_cat, :] = cat_out.astype(out_ref.dtype)
    out_ref[:, f_cat:, :] = num_out.astype(out_ref.dtype)


def _pick_batch_tile(batch, tb_cap):
    """Largest power-of-two tile <= tb_cap that still yields >= 2 grid steps
    (so the 'parallel' axis shards across v7x's two TensorCores)."""
    for cand in (1024, 512, 256, 128, 64, 32, 16, 8):
        if cand <= tb_cap and 2 * cand <= max(batch, 16):
            return cand
    return 8


def embedding_layer_forward(x_idx, x_num, emb_table, cat_bias, num_weight, num_bias):
    """x_idx: [B, F_cat] int32; x_num: [B, F_num] f32;
    emb_table: [E, D] f32; cat_bias: [F_cat, D]; num_weight/num_bias: [F_num, D]."""
    B, f_cat = x_idx.shape
    _, f_num = x_num.shape
    n_emb, d = emb_table.shape
    assert cat_bias.shape == (f_cat, d)
    assert num_weight.shape == (f_num, d) and num_bias.shape == (f_num, d)
    f_tot = f_cat + f_num

    # ---- pad table rows to a multiple of 128 and build the 3-way bf16 split --
    e_pad = max(128, ((n_emb + 127) // 128) * 128)
    table = jnp.pad(emb_table, ((0, e_pad - n_emb), (0, 0)))
    t_hi = table.astype(jnp.bfloat16)
    r1 = table - t_hi.astype(jnp.float32)
    t_mid = r1.astype(jnp.bfloat16)
    t_lo = (r1 - t_mid.astype(jnp.float32)).astype(jnp.bfloat16)
    tsplit = jnp.stack([t_hi, t_mid, t_lo], axis=0)                   # (3, E_pad, D) bf16

    # ---- per-generation VMEM budgeting (v7x 64 MiB -> tb<=512; 128 MiB -> 1024)
    try:
        vmem_cap = int(getattr(pltpu.get_tpu_info(), "vmem_capacity_bytes", 64 << 20))
    except Exception:  # conservative fallback
        vmem_cap = 64 << 20
    bytes_per_row = (2 * f_tot * d * 4            # double-buffered f32 output block
                     + f_cat * e_pad * 2          # bf16 one-hot
                     + 2 * f_cat * d * 4          # gathered + cat_out temporaries
                     + f_num * d * 4              # num_out temporary
                     + 2 * (f_cat + f_num) * 4)   # input blocks (double-buffered)
    budget = max(8 << 20, vmem_cap // 3)
    tb_cap = 8
    for cand in (1024, 512, 256, 128, 64, 32, 16, 8):
        if cand * bytes_per_row <= budget:
            tb_cap = cand
            break
    tb = _pick_batch_tile(B, tb_cap)

    # ---- pad batch: B % tb == 0 and >= 2 grid steps ---------------------------
    n_steps = max(pl.cdiv(B, tb), 2)
    b_pad = n_steps * tb
    if b_pad != B:
        x_idx = jnp.pad(x_idx, ((0, b_pad - B), (0, 0)))   # index 0 is valid
        x_num = jnp.pad(x_num, ((0, b_pad - B), (0, 0)))

    grid_spec = pltpu.PrefetchScalarGridSpec(
        num_scalar_prefetch=0,
        grid=(n_steps,),
        in_specs=[
            # batch-tiled inputs
            pl.BlockSpec((tb, f_cat), lambda b: (b, 0)),
            pl.BlockSpec((tb, f_num), lambda b: (b, 0)),
            # VMEM-resident parameters (constant block index -> fetched once)
            pl.BlockSpec((3, e_pad, d), lambda b: (0, 0, 0)),
            pl.BlockSpec((f_cat, d), lambda b: (0, 0)),
            pl.BlockSpec((f_num, d), lambda b: (0, 0)),
            pl.BlockSpec((f_num, d), lambda b: (0, 0)),
        ],
        out_specs=pl.BlockSpec((tb, f_tot, d), lambda b: (b, 0, 0)),
    )

    out3 = pl.pallas_call(
        _embedding_layer_kernel,
        out_shape=jax.ShapeDtypeStruct((b_pad, f_tot, d), emb_table.dtype),
        grid_spec=grid_spec,
        compiler_params=pltpu.CompilerParams(
            dimension_semantics=("parallel",),                 # 2 TCs split the batch
            vmem_limit_bytes=max(32 << 20, int(0.75 * vmem_cap)),
        ),
    )(x_idx, x_num, tsplit, cat_bias, num_weight, num_bias)

    if b_pad != B:
        out3 = out3[:B]
    # PyTorch forward ends with reshape(bs, seq*dim): contiguous, free in XLA.
    return out3.reshape(B, f_tot * d)


if __name__ == "__main__":
    # Small shapes consistent with the module.
    num_embeds = 64
    nfts_cat = 8        # categorical + binary columns
    nfts_num = 4        # numerical columns
    ndims = 128
    batch = 8

    key = jax.random.PRNGKey(0)
    k_emb, k_cbias, k_w, k_nbias, k_idx, k_num = jax.random.split(key, 6)

    # Deterministic parameter init (nn.Embedding ~ N(0,1); biases normal_();
    # NumEmbedding weight/bias ~ N(0, 0.02)).
    emb_table = jax.random.normal(k_emb, (num_embeds, ndims), dtype=jnp.float32)
    cat_bias = jax.random.normal(k_cbias, (nfts_cat, ndims), dtype=jnp.float32)
    num_weight = 0.02 * jax.random.normal(k_w, (nfts_num, ndims), dtype=jnp.float32)
    num_bias = 0.02 * jax.random.normal(k_nbias, (nfts_num, ndims), dtype=jnp.float32)

    # Integer category indices per categorical column, float numeric features.
    x_idx = jax.random.randint(k_idx, (batch, nfts_cat), 0, num_embeds, dtype=jnp.int32)
    x_num = jax.random.normal(k_num, (batch, nfts_num), dtype=jnp.float32)

    fwd = jax.jit(embedding_layer_forward)
    out = fwd(x_idx, x_num, emb_table, cat_bias, num_weight, num_bias)
    out = jax.block_until_ready(out)

    # Reference: plain-JAX equivalent of the PyTorch forward.
    ref_cat = jnp.take(emb_table, x_idx, axis=0) + cat_bias[None]
    ref_num = num_weight[None] * x_num[..., None] + num_bias[None]
    ref = jnp.concatenate([ref_cat, ref_num], axis=1).reshape(batch, -1)

    assert out.shape == (batch, (nfts_cat + nfts_num) * ndims)
    assert jnp.allclose(out, ref, atol=1e-5, rtol=1e-5), "mismatch vs reference"

    print("KERNEL_OK")
</pallas_src>

<mosaic_0001>
module attributes {stable_mosaic.version = 11 : i64} {
  func.func @_embedding_layer_kernel(%arg0: i32, %arg1: memref<8x8xi32, #tpu.memory_space<vmem>>, %arg2: memref<8x4xf32, #tpu.memory_space<vmem>>, %arg3: memref<3x128x128xbf16, #tpu.memory_space<vmem>>, %arg4: memref<8x128xf32, #tpu.memory_space<vmem>>, %arg5: memref<4x128xf32, #tpu.memory_space<vmem>>, %arg6: memref<4x128xf32, #tpu.memory_space<vmem>>, %arg7: memref<8x12x128xf32, #tpu.memory_space<vmem>>) attributes {dimension_semantics = [#tpu.dimension_semantics<parallel>], iteration_bounds = array<i64: 2>, scalar_prefetch = 0 : i64, scratch_operands = 0 : i64, tpu.core_type = #tpu.core_type<tc>, window_params = [{transform_indices = @transform_0, window_bounds = array<i64: 8, 8>}, {transform_indices = @transform_1, window_bounds = array<i64: 8, 4>}, {pipeline_mode = #tpu.pipeline_mode<synchronous>, transform_indices = @transform_2, window_bounds = array<i64: 3, 128, 128>}, {pipeline_mode = #tpu.pipeline_mode<synchronous>, transform_indices = @transform_3, window_bounds = array<i64: 8, 128>}, {pipeline_mode = #tpu.pipeline_mode<synchronous>, transform_indices = @transform_4, window_bounds = array<i64: 4, 128>}, {pipeline_mode = #tpu.pipeline_mode<synchronous>, transform_indices = @transform_5, window_bounds = array<i64: 4, 128>}, {transform_indices = @transform_6, window_bounds = array<i64: 8, 12, 128>}]} {
    %c0 = arith.constant 0 : index
    %c0_0 = arith.constant 0 : index
    %0 = vector.load %arg1[%c0, %c0_0] : memref<8x8xi32, #tpu.memory_space<vmem>>, vector<8x8xi32>
    %1 = tpu.iota {dimensions = array<i32: 2>} : vector<8x8x128xi32>
    %2 = vector.shape_cast %0 : vector<8x8xi32> to vector<8x8x1xi32>
    %3 = vector.broadcast %2 : vector<8x8x1xi32> to vector<8x8x128xi32>
    %4 = arith.cmpi eq, %3, %1 : vector<8x8x128xi32>
    %5 = arith.extui %4 : vector<8x8x128xi1> to vector<8x8x128xi32>
    %6 = arith.sitofp %5 : vector<8x8x128xi32> to vector<8x8x128xf32>
    %7 = arith.truncf %6 : vector<8x8x128xf32> to vector<8x8x128xbf16>
    %8 = vector.shape_cast %7 : vector<8x8x128xbf16> to vector<64x128xbf16>
    %c0_1 = arith.constant 0 : index
    %c0_2 = arith.constant 0 : index
    %c0_3 = arith.constant 0 : index
    %9 = vector.load %arg3[%c0_1, %c0_2, %c0_3] : memref<3x128x128xbf16, #tpu.memory_space<vmem>>, vector<1x128x128xbf16>
    %10 = vector.shape_cast %9 : vector<1x128x128xbf16> to vector<128x128xbf16>
    %cst = arith.constant dense<0.000000e+00> : vector<64x128xf32>
    %11 = tpu.matmul %8, %10, %cst {dimension_numbers = #tpu.dot_dimension_numbers<[1], [0], [0], [1], [0, 0, 1, 1], [], []>} : vector<64x128xbf16>, vector<128x128xbf16>, vector<64x128xf32> -> vector<64x128xf32>
    %c1 = arith.constant 1 : index
    %c0_4 = arith.constant 0 : index
    %c0_5 = arith.constant 0 : index
    %12 = vector.load %arg3[%c1, %c0_4, %c0_5] : memref<3x128x128xbf16, #tpu.memory_space<vmem>>, vector<1x128x128xbf16>
    %13 = vector.shape_cast %12 : vector<1x128x128xbf16> to vector<128x128xbf16>
    %cst_6 = arith.constant dense<0.000000e+00> : vector<64x128xf32>
    %14 = tpu.matmul %8, %13, %cst_6 {dimension_numbers = #tpu.dot_dimension_numbers<[1], [0], [0], [1], [0, 0, 1, 1], [], []>} : vector<64x128xbf16>, vector<128x128xbf16>, vector<64x128xf32> -> vector<64x128xf32>
    %15 = arith.addf %11, %14 : vector<64x128xf32>
    %c2 = arith.constant 2 : index
    %c0_7 = arith.constant 0 : index
    %c0_8 = arith.constant 0 : index
    %16 = vector.load %arg3[%c2, %c0_7, %c0_8] : memref<3x128x128xbf16, #tpu.memory_space<vmem>>, vector<1x128x128xbf16>
    %17 = vector.shape_cast %16 : vector<1x128x128xbf16> to vector<128x128xbf16>
    %cst_9 = arith.constant dense<0.000000e+00> : vector<64x128xf32>
    %18 = tpu.matmul %8, %17, %cst_9 {dimension_numbers = #tpu.dot_dimension_numbers<[1], [0], [0], [1], [0, 0, 1, 1], [], []>} : vector<64x128xbf16>, vector<128x128xbf16>, vector<64x128xf32> -> vector<64x128xf32>
    %19 = arith.addf %15, %18 : vector<64x128xf32>
    %20 = vector.shape_cast %19 : vector<64x128xf32> to vector<8x8x128xf32>
    %c0_10 = arith.constant 0 : index
    %c0_11 = arith.constant 0 : index
    %21 = vector.load %arg4[%c0_10, %c0_11] : memref<8x128xf32, #tpu.memory_space<vmem>>, vector<8x128xf32>
    %22 = vector.shape_cast %21 : vector<8x128xf32> to vector<1x8x128xf32>
    %23 = vector.broadcast %22 : vector<1x8x128xf32> to vector<8x8x128xf32>
    %24 = arith.addf %20, %23 : vector<8x8x128xf32>
    %c0_12 = arith.constant 0 : index
    %c0_13 = arith.constant 0 : index
    %25 = vector.load %arg5[%c0_12, %c0_13] : memref<4x128xf32, #tpu.memory_space<vmem>>, vector<4x128xf32>
    %26 = vector.shape_cast %25 : vector<4x128xf32> to vector<1x4x128xf32>
    %c0_14 = arith.constant 0 : index
    %c0_15 = arith.constant 0 : index
    %27 = vector.load %arg2[%c0_14, %c0_15] : memref<8x4xf32, #tpu.memory_space<vmem>>, vector<8x4xf32>
    %28 = vector.shape_cast %27 : vector<8x4xf32> to vector<8x4x1xf32>
    %29 = vector.broadcast %26 : vector<1x4x128xf32> to vector<8x4x128xf32>
    %30 = vector.broadcast %28 : vector<8x4x1xf32> to vector<8x4x128xf32>
    %31 = arith.mulf %29, %30 : vector<8x4x128xf32>
    %c0_16 = arith.constant 0 : index
    %c0_17 = arith.constant 0 : index
    %32 = vector.load %arg6[%c0_16, %c0_17] : memref<4x128xf32, #tpu.memory_space<vmem>>, vector<4x128xf32>
    %33 = vector.shape_cast %32 : vector<4x128xf32> to vector<1x4x128xf32>
    %34 = vector.broadcast %33 : vector<1x4x128xf32> to vector<8x4x128xf32>
    %35 = arith.addf %31, %34 : vector<8x4x128xf32>
    %c0_18 = arith.constant 0 : index
    %c0_19 = arith.constant 0 : index
    %c0_20 = arith.constant 0 : index
    %36 = vector.load %arg7[%c0_18, %c0_19, %c0_20] : memref<8x12x128xf32, #tpu.memory_space<vmem>>, vector<8x8x128xf32>
    tpu.vector_store %arg7[%c0_18, %c0_19, %c0_20], %24 {strides = array<i32>} : memref<8x12x128xf32, #tpu.memory_space<vmem>>, vector<8x8x128xf32>,
    %c0_21 = arith.constant 0 : index
    %c8 = arith.constant 8 : index
    %c0_22 = arith.constant 0 : index
    %37 = vector.load %arg7[%c0_21, %c8, %c0_22] : memref<8x12x128xf32, #tpu.memory_space<vmem>>, vector<8x4x128xf32>
    tpu.vector_store %arg7[%c0_21, %c8, %c0_22], %35 {strides = array<i32>} : memref<8x12x128xf32, #tpu.memory_space<vmem>>, vector<8x4x128xf32>,
    return
  }
  func.func @transform_0(%arg0: i32) -> (i32, i32) {
    %c0_i32 = arith.constant 0 : i32
    %c0_i32_0 = arith.constant 0 : i32
    return %arg0, %c0_i32 : i32, i32
  }
  func.func @transform_1(%arg0: i32) -> (i32, i32) {
    %c0_i32 = arith.constant 0 : i32
    %c0_i32_0 = arith.constant 0 : i32
    return %arg0, %c0_i32 : i32, i32
  }
  func.func @transform_2(%arg0: i32) -> (i32, i32, i32) {
    %c0_i32 = arith.constant 0 : i32
    %c0_i32_0 = arith.constant 0 : i32
    %c0_i32_1 = arith.constant 0 : i32
    %c0_i32_2 = arith.constant 0 : i32
    return %c0_i32, %c0_i32_0, %c0_i32_1 : i32, i32, i32
  }
  func.func @transform_3(%arg0: i32) -> (i32, i32) {
    %c0_i32 = arith.constant 0 : i32
    %c0_i32_0 = arith.constant 0 : i32
    %c0_i32_1 = arith.constant 0 : i32
    return %c0_i32, %c0_i32_0 : i32, i32
  }
  func.func @transform_4(%arg0: i32) -> (i32, i32) {
    %c0_i32 = arith.constant 0 : i32
    %c0_i32_0 = arith.constant 0 : i32
    %c0_i32_1 = arith.constant 0 : i32
    return %c0_i32, %c0_i32_0 : i32, i32
  }
  func.func @transform_5(%arg0: i32) -> (i32, i32) {
    %c0_i32 = arith.constant 0 : i32
    %c0_i32_0 = arith.constant 0 : i32
    %c0_i32_1 = arith.constant 0 : i32
    return %c0_i32, %c0_i32_0 : i32, i32
  }
  func.func @transform_6(%arg0: i32) -> (i32, i32, i32) {
    %c0_i32 = arith.constant 0 : i32
    %c0_i32_0 = arith.constant 0 : i32
    %c0_i32_1 = arith.constant 0 : i32
    return %arg0, %c0_i32, %c0_i32_0 : i32, i32, i32
  }
}

</mosaic_0001>

<bundles_post_ra>
// kernel: embedding_layer_forward.1
= control target key start
LH: loop header
LB: loop body
LE: loop exit
PB: predicated region body
PF: predicated region fallthrough
CT: control target
= control target key end

     0   :  { %s1262_s21 = smov 0   ;;  %s1469_s0 = inlined_call_operand.vmem [shape: s32[16,8], index: 0, kind: input, shape index: {}]   ;;  %s1470_s1 = inlined_call_operand.vmem [shape: f32[16,4], index: 1, kind: input, shape index: {}]   ;;  %s1471_s2 = inlined_call_operand.vmem [shape: bf16[3,128,128], index: 2, kind: input, shape index: {}]   ;;  %s1472_s3 = inlined_call_operand.vmem [shape: f32[8,128], index: 3, kind: input, shape index: {}]   ;;  %s1473_s4 = inlined_call_operand.vmem [shape: f32[4,128], index: 4, kind: input, shape index: {}]   ;;  %s1474_s5 = inlined_call_operand.vmem [shape: f32[4,128], index: 5, kind: input, shape index: {}]   ;;  %s1475_s6 = inlined_call_operand.vmem [shape: f32[16,12,128], index: 6, kind: output, shape index: {}]  }
   0x1 LB: > { %s1268_s22 = sadd.s32 4294967295, %s1224_s21   ;;  %p956_p0 = scmp.ge.s32.totalorder %s1224_s21, 1  ;;  %s1224_s21 = sphi %s1262_s21, %s16_s21  }
   0x2   : > { %p220_p1 = scmp.lt.s32.totalorder %s1224_s21, 3 }
   0x4   : > { %p221_p2 = pnand %p956_p0, %p220_p1 }
   0x5   : > { %p254_p3 = scmp.lt.s32.totalorder (!%p221_p2), %s1268_s22, 1  ;;  %s959_s13 = sshll.u32 (!%p221_p2), %s1268_s22, 3 }
   0x6   : > { %224 = sbr.rel (%p221_p2) target bundleno = 378 (0x17a), region = 44  ;;  %p263_p4 = scmp.lt.s32.totalorder (!%p221_p2), %s959_s13, 15 }
   0xb   : > { %v271_v0 = vlaneseq  ;;  %v1194_v1 = vld [vmem:[%s1471_s2 + $0x78] sm:$0xff]   ;;  %s1280_s27 = scalar_select %p254_p3, %s1268_s22, 1  ;;  %v1196_v4 = vld [vmem:[%s1471_s2 + $0x70] sm:$0xff]   ;;  %v1198_v11 = vld [vmem:[%s1471_s2 + $0x68] sm:$0xff]   ;;  %v1226_v53 = vmov 1.0|1.0  }
   0xc   : > { %v1195_v2 = vld [vmem:[%s1471_s2 + $0x38] sm:$0xff]   ;;  %1097 = vmatprep.subr.bf16.mxu0 %v1194_v1  ;;  %v1197_v7 = vld [vmem:[%s1471_s2 + $0x30] sm:$0xff]   ;;  %v1199_v15 = vld [vmem:[%s1471_s2 + $0x28] sm:$0xff]   ;;  %s1485_s13 = smov (!%p263_p4, %s959_s13), 15 }
   0xd   : > { %v1283_v3 = vshrl.u32 %v271_v0, 7  ;;  %1121 = vmatprep.subr.bf16.mxu1 %v1195_v2  ;;  %1098 = vmatpush3.bf16.msra.mxu0 %v1194_v1  ;;  %s957_s30 = sshll.u32 %s1280_s27, 3  ;;  %v1200_v17 = vld [vmem:[%s1471_s2 + $0x60] sm:$0xff]   ;;  %v1202_v22 = vld [vmem:[%s1471_s2 + $0x58] sm:$0xff]   ;;  %v1204_v27 = vld [vmem:[%s1471_s2 + $0x50] sm:$0xff]   ;;  %v272_v47 = vand.u32 127, %v271_v0 }
   0xe   : > { %1122 = vmatpush3.bf16.msra.mxu1 %v1195_v2  ;;  %s257_s11 = scalar_lea.vmem %s1469_s0, %s957_s30  ;;  %1099 = vmatprep.subr.bf16.mxu0 %v1196_v4  ;;  %v1201_v20 = vld [vmem:[%s1471_s2 + $0x20] sm:$0xff]   ;;  %v1203_v26 = vld [vmem:[%s1471_s2 + $0x18] sm:$0xff]   ;;  %v1205_v30 = vld [vmem:[%s1471_s2 + $0x10] sm:$0xff]   ;;  %s261_s20 = scalar_lea.vmem %s1470_s1, %s957_s30 }
   0xf   : > { %v289_v5 = vsub.s32 2, %v1283_v3  ;;  %v275_v6 = vsub.s32 0, %v1283_v3  ;;  %v296_v8 = vsub.s32 3, %v1283_v3  ;;  %v282_v9 = vsub.s32 1, %v1283_v3  ;;  %v270_v10 = vld [vmem:[%s257_s11] sm:$0xff]  ;;  %1123 = vmatprep.subr.bf16.mxu1 %v1197_v7  ;;  %v1206_v31 = vld [vmem:[%s1471_s2 + $0x48] sm:$0xff]  }
  0x10   : > { %v310_v14 = vsub.s32 5, %v1283_v3  ;;  %v303_v16 = vsub.s32 4, %v1283_v3  ;;  %v324_v21 = vsub.s32 7, %v1283_v3  ;;  %v317_v25 = vsub.s32 6, %v1283_v3  ;;  %v1207_v32 = vld [vmem:[%s1471_s2 + $0x8] sm:$0xff]   ;;  %v1208_v33 = vld [vmem:[%s1471_s2 + $0x40] sm:$0xff]  }
  0x11   : > { %v290_v12 = vrot.slane %v270_v10, %v289_v5  ;;  %v276_v13 = vrot.slane %v270_v10, %v275_v6  ;;  %1100 = vmatpush3.bf16.msra.mxu0 %v1196_v4  ;;  %v297_v18 = vrot.slane %v270_v10, %v296_v8  ;;  %v283_v19 = vrot.slane %v270_v10, %v282_v9  ;;  %v1209_v34 = vld [vmem:[%s1471_s2] sm:$0xff]   ;;  %v1210_v35 = vld [vmem:[%s1471_s2 + $0xb8] sm:$0xff]   ;;  %v1211_v52 = vld [vmem:[%s1471_s2 + $0xb0] sm:$0xff]   ;;  %s1032_s18 = sshll.u32 %s1485_s13, 4 }
  0x12   : > { %1124 = vmatpush3.bf16.msra.mxu1 %v1197_v7  ;;  %1101 = vmatprep.subr.bf16.mxu0 %v1198_v11  ;;  %v311_v23 = vrot.slane %v270_v10, %v310_v14  ;;  %v304_v24 = vrot.slane %v270_v10, %v303_v16  ;;  %v325_v28 = vrot.slane %v270_v10, %v324_v21  ;;  %v792_v36 = vld [vmem:[%s261_s20] sm:$0xff]  ;;  %v1212_v57 = vld [vmem:[%s1471_s2 + $0xa8] sm:$0xff]   ;;  %v1214_v62 = vld [vmem:[%s1471_s2 + $0x98] sm:$0xff]   ;;  %s1445_s20 = scalar_lea.vmem %s1475_s6, %s1032_s18 }
  0x13   : > { %292 = vbcast.lane.b32.xlu1 %v290_v12, 256  ;;  %278 = vbcast.lane.b32.xlu0 %v276_v13, 256  ;;  %v318_v29 = vrot.slane %v270_v10, %v317_v25  ;;  %v803_v37 = vrot.slane %v792_v36, %v282_v9  ;;  %v796_v38 = vrot.slane %v792_v36, %v275_v6  ;;  %v1213_v61 = vld [vmem:[%s1471_s2 + $0xa0] sm:$0xff]   ;;  %v1215_v63 = vld [vmem:[%s1471_s2 + $0x90] sm:$0xff]   ;;  %v1216_v0 = vld [vmem:[%s1471_s2 + $0x88] sm:$0xff]  }
  0x14   : > { %1125 = vmatprep.subr.bf16.mxu1 %v1199_v15  ;;  %v817_v39 = vrot.slane %v792_v36, %v296_v8  ;;  %v810_v40 = vrot.slane %v792_v36, %v289_v5  ;;  %v831_v41 = vrot.slane %v792_v36, %v310_v14  ;;  %v824_v42 = vrot.slane %v792_v36, %v303_v16  ;;  %v1217_v1 = vld [vmem:[%s1471_s2 + $0x80] sm:$0xff]  }
  0x15   : > { %1102 = vmatpush3.bf16.msra.mxu0 %v1198_v11  ;;  %v845_v43 = vrot.slane %v792_v36, %v324_v21  ;;  %v838_v44 = vrot.slane %v792_v36, %v317_v25  ;;  %v791_v2 = vld [vmem:[%s1473_s4] sm:$0xf] }
  0x16   : > { %1126 = vmatpush3.bf16.msra.mxu1 %v1199_v15  ;;  %1103 = vmatprep.subr.bf16.mxu0 %v1200_v17  ;;  %v857_v3 = vld [vmem:[%s1474_s5] sm:$0xf] }
  0x17   : > { %299 = vbcast.lane.b32.xlu1 %v297_v18, 256  ;;  %285 = vbcast.lane.b32.xlu0 %v283_v19, 256 }
  0x18   : > { %1127 = vmatprep.subr.bf16.mxu1 %v1201_v20 }
  0x19   : > { %1104 = vmatpush3.bf16.msra.mxu0 %v1200_v17 }
  0x1a   : > { %1128 = vmatpush3.bf16.msra.mxu1 %v1201_v20  ;;  %1105 = vmatprep.subr.bf16.mxu0 %v1202_v22 }
  0x1b   : > { %313 = vbcast.lane.b32.xlu1 %v311_v23, 256  ;;  %306 = vbcast.lane.b32.xlu0 %v304_v24, 256 }
  0x1c   : > { %1129 = vmatprep.subr.bf16.mxu1 %v1203_v26 }
  0x1d   : > { %1106 = vmatpush3.bf16.msra.mxu0 %v1202_v22 }
  0x1e   : > { %1130 = vmatpush3.bf16.msra.mxu1 %v1203_v26  ;;  %1107 = vmatprep.subr.bf16.mxu0 %v1204_v27 }
  0x1f   : > { %327 = vbcast.lane.b32.xlu1 %v325_v28, 256  ;;  %320 = vbcast.lane.b32.xlu0 %v318_v29, 256 }
  0x20   : > { %1131 = vmatprep.subr.bf16.mxu1 %v1205_v30 }
  0x21   : > { %1108 = vmatpush3.bf16.msra.mxu0 %v1204_v27 }
  0x22   : > { %1132 = vmatpush3.bf16.msra.mxu1 %v1205_v30  ;;  %1109 = vmatprep.subr.bf16.mxu0 %v1206_v31 }
  0x23   : > { %1133 = vmatprep.subr.bf16.mxu1 %v1207_v32  ;;  %805 = vbcast.lane.b32.xlu1 %v803_v37, 256 }
  0x24   : > { %798 = vbcast.lane.b32.xlu0 %v796_v38, 256 }
  0x25   : > { %1110 = vmatpush3.bf16.msra.mxu0 %v1206_v31 }
  0x26   : > { %1134 = vmatpush3.bf16.msra.mxu1 %v1207_v32  ;;  %1111 = vmatprep.subr.bf16.mxu0 %v1208_v33 }
  0x27   : > { %1135 = vmatprep.subr.bf16.mxu1 %v1209_v34  ;;  %819 = vbcast.lane.b32.xlu1 %v817_v39, 256 }
  0x28   : > { %812 = vbcast.lane.b32.xlu0 %v810_v40, 256 }
  0x29   : > { %1112 = vmatpush3.bf16.msra.mxu0 %v1208_v33 }
  0x2a   : > { %1136 = vmatpush3.bf16.msra.mxu1 %v1209_v34  ;;  %1145 = vmatprep.subr.bf16.mxu0 %v1210_v35 }
  0x2b   : > { %1169 = vmatprep.subr.bf16.mxu1 %v1210_v35  ;;  %833 = vbcast.lane.b32.xlu1 %v831_v41, 256 }
  0x2c   : > { %826 = vbcast.lane.b32.xlu0 %v824_v42, 256 }
  0x2f   : > { %847 = vbcast.lane.b32.xlu1 %v845_v43, 256 }
  0x30   : > { %840 = vbcast.lane.b32.xlu0 %v838_v44, 256 }
  0x85   : > { %v293_v45 = vpop.permute.xlu1 %292  ;;  %v279_v46 = vpop.permute.xlu0 %278 }
  0x86   : > { %vm331_vm0 = vcmp.eq.s32.totalorder %v293_v45, %v272_v47  ;;  %vm329_vm3 = vcmp.eq.s32.totalorder %v279_v46, %v272_v47 }
  0x89   : > { %v300_v48 = vpop.permute.xlu1 %299  ;;  %v286_v49 = vpop.permute.xlu0 %285 }
  0x8a   : > { %vm332_vm1 = vcmp.eq.s32.totalorder %v300_v48, %v272_v47  ;;  %vm330_vm2 = vcmp.eq.s32.totalorder %v286_v49, %v272_v47 }
  0x8b   : > { %vm1374_vm4 = vmpackc.low %vm332_vm1, %vm331_vm0 }
  0x8c   : > { %vm1378_vm5 = vmpackc.low %vm330_vm2, %vm329_vm3 }
  0x8d   : > { %1113 = vmatprep.mubr.msk.bf16.mxu0 %vm1378_vm5, %v1226_v53  ;;  %1137 = vmatprep.mubr.msk.bf16.mxu1 %vm1378_vm5, %v1226_v53  ;;  %v314_v54 = vpop.permute.xlu1 %313  ;;  %v307_v55 = vpop.permute.xlu0 %306 }
  0x8e   : > { %1114 = vmatmul.mubr.msk.bf16.vlgmr.msra.gmra.mxu0 %vm1374_vm4, %v1226_v53  ;;  %1138 = vmatmul.mubr.msk.bf16.vlgmr.msra.gmra.mxu1 %vm1374_vm4, %v1226_v53  ;;  %vm334_vm6 = vcmp.eq.s32.totalorder %v314_v54, %v272_v47  ;;  %vm333_vm7 = vcmp.eq.s32.totalorder %v307_v55, %v272_v47 }
  0x8f   : > { %1146 = vmatpush3.bf16.msra.mxu0 %v1210_v35  ;;  %1177 = vmatpush3.bf16.msra.mxu1 %v1210_v35  ;;  %vm1393_vm8 = vmpackc.low %vm334_vm6, %vm333_vm7 }
  0x90   : > { %1147 = vmatprep.subr.bf16.mxu0 %v1211_v52  ;;  %1170 = vmatprep.subr.bf16.mxu1 %v1211_v52 }
  0x91   : > { %v328_v58 = vpop.permute.xlu1 %327  ;;  %v321_v59 = vpop.permute.xlu0 %320  ;;  %1117 = vmatprep.mubr.msk.bf16.mxu0 %vm1393_vm8, %v1226_v53  ;;  %1141 = vmatprep.mubr.msk.bf16.mxu1 %vm1393_vm8, %v1226_v53 }
  0x92   : > { %vm336_vm9 = vcmp.eq.s32.totalorder %v328_v58, %v272_v47  ;;  %vm335_vm10 = vcmp.eq.s32.totalorder %v321_v59, %v272_v47  ;;  %v782_v47 = vld [vmem:[%s1472_s3] sm:$0xff] }
  0x93   : > { %1148 = vmatpush3.bf16.msra.mxu0 %v1211_v52  ;;  %1178 = vmatpush3.bf16.msra.mxu1 %v1211_v52  ;;  %vm1404_vm11 = vmpackc.low %vm336_vm9, %vm335_vm10 }
  0x94   : > { %1149 = vmatprep.subr.bf16.mxu0 %v1212_v57  ;;  %1171 = vmatprep.subr.bf16.mxu1 %v1212_v57 }
  0x95   : > { %v806_v4 = vpop.permute.xlu1 %805 }
  0x96   : > { %1118 = vmatmul.mubr.msk.bf16.gmra.mxu0 %vm1404_vm11, %v1226_v53  ;;  %1142 = vmatmul.mubr.msk.bf16.gmra.mxu1 %vm1404_vm11, %v1226_v53  ;;  %v799_v5 = vpop.permute.xlu0 %798  ;;  %v850_v6 = vmul.f32 %v806_v4, %v791_v2 }
  0x97   : > { %1150 = vmatpush3.bf16.msra.mxu0 %v1212_v57  ;;  %1179 = vmatpush3.bf16.msra.mxu1 %v1212_v57  ;;  %v849_v7 = vmul.f32 %v799_v5, %v791_v2 }
  0x98   : > { %1161 = vmatprep.mubr.msk.bf16.mxu0 %vm1378_vm5, %v1226_v53  ;;  %1151 = vmatprep.subr.bf16.mxu0 %v1213_v61  ;;  %v859_v8 = vadd.f32 %v857_v3, %v850_v6 }
  0x99   : > { %1172 = vmatprep.subr.bf16.mxu1 %v1213_v61  ;;  %1165 = vmatprep.mubr.msk.bf16.mxu1 %vm1393_vm8, %v1226_v53  ;;  %v858_v9 = vadd.f32 %v857_v3, %v849_v7  ;;  %v820_v10 = vpop.permute.xlu1 %819 }
  0x9a   : > { %v813_v11 = vpop.permute.xlu0 %812  ;;  %v852_v12 = vmul.f32 %v820_v10, %v791_v2  ;;  %875 = vst [vmem:[%s1445_s20 + $0x18] sm:$0xf] %v859_v8 }
  0x9b   : > { %1152 = vmatpush3.bf16.msra.mxu0 %v1213_v61  ;;  %1180 = vmatpush3.bf16.msra.mxu1 %v1213_v61  ;;  %v851_v13 = vmul.f32 %v813_v11, %v791_v2  ;;  %874 = vst [vmem:[%s1445_s20 + $0x8] sm:$0xf] %v858_v9 }
  0x9c   : > { %1153 = vmatprep.subr.bf16.mxu0 %v1214_v62  ;;  %1173 = vmatprep.subr.bf16.mxu1 %v1214_v62  ;;  %v861_v14 = vadd.f32 %v857_v3, %v852_v12 }
  0x9d   : > { %v860_v15 = vadd.f32 %v857_v3, %v851_v13  ;;  %v834_v16 = vpop.permute.xlu1 %833 }
  0x9e   : > { %877 = vst [vmem:[%s1445_s20 + $0x38] sm:$0xf] %v861_v14  ;;  %v827_v17 = vpop.permute.xlu0 %826  ;;  %v854_v18 = vmul.f32 %v834_v16, %v791_v2 }
  0x9f   : > { %1154 = vmatpush3.bf16.msra.mxu0 %v1214_v62  ;;  %1181 = vmatpush3.bf16.msra.mxu1 %v1214_v62  ;;  %876 = vst [vmem:[%s1445_s20 + $0x28] sm:$0xf] %v860_v15  ;;  %v853_v19 = vmul.f32 %v827_v17, %v791_v2 }
  0xa0   : > { %1155 = vmatprep.subr.bf16.mxu0 %v1215_v63  ;;  %1174 = vmatprep.subr.bf16.mxu1 %v1215_v63  ;;  %v863_v20 = vadd.f32 %v857_v3, %v854_v18 }
  0xa1   : > { %v862_v21 = vadd.f32 %v857_v3, %v853_v19  ;;  %v848_v22 = vpop.permute.xlu1 %847 }
  0xa2   : > { %v841_v23 = vpop.permute.xlu0 %840  ;;  %879 = vst [vmem:[%s1445_s20 + $0x58] sm:$0xf] %v863_v20  ;;  %v856_v24 = vmul.f32 %v848_v22, %v791_v2 }
  0xa3   : > { %1156 = vmatpush3.bf16.msra.mxu0 %v1215_v63  ;;  %1182 = vmatpush3.bf16.msra.mxu1 %v1215_v63  ;;  %878 = vst [vmem:[%s1445_s20 + $0x48] sm:$0xf] %v862_v21  ;;  %v855_v25 = vmul.f32 %v841_v23, %v791_v2 }
  0xa4   : > { %1157 = vmatprep.subr.bf16.mxu0 %v1216_v0  ;;  %1175 = vmatprep.subr.bf16.mxu1 %v1216_v0  ;;  %v865_v26 = vadd.f32 %v857_v3, %v856_v24 }
  0xa5   : > { %v864_v27 = vadd.f32 %v857_v3, %v855_v25 }
  0xa6   : > { %881 = vst [vmem:[%s1445_s20 + $0x78] sm:$0xf] %v865_v26 }
  0xa7   : > { %1158 = vmatpush3.bf16.msra.mxu0 %v1216_v0  ;;  %1183 = vmatpush3.bf16.msra.mxu1 %v1216_v0  ;;  %880 = vst [vmem:[%s1445_s20 + $0x68] sm:$0xf] %v864_v27 }
  0xa8   : > { %1159 = vmatprep.subr.bf16.mxu0 %v1217_v1  ;;  %1176 = vmatprep.subr.bf16.mxu1 %v1217_v1 }
  0xab   : > { %1160 = vmatpush3.bf16.msra.mxu0 %v1217_v1  ;;  %1184 = vmatpush3.bf16.msra.mxu1 %v1217_v1 }
  0xae   : > { %1162 = vmatmul.mubr.msk.bf16.vlgmr.msra.gmra.mxu0 %vm1374_vm4, %v1226_v53  ;;  %1166 = vmatmul.mubr.msk.bf16.vlgmr.msra.gmra.mxu1 %vm1404_vm11, %v1226_v53 }
 0x14e   : > { %v1115_v28 = vpop.f32.mrf.mxu0  ;;  %v1139_v29 = vpop.f32.mrf.mxu1 }
 0x14f   : > { %v622_v44 = vadd.f32 %v1139_v29, %v1115_v28 }
 0x150   : > { %v500_v30 = vpop.f32.mrf.mxu0  ;;  %v613_v31 = vpop.f32.mrf.mxu1 }
 0x151   : > { %v614_v49 = vadd.f32 %v613_v31, %v500_v30 }
 0x152   : > { %v1116_v32 = vpop.f32.mrf.mxu0  ;;  %v1140_v33 = vpop.f32.mrf.mxu1 }
 0x153   : > { %v625_v53 = vadd.f32 %v1140_v33, %v1116_v32 }
 0x154   : > { %v503_v34 = vpop.f32.mrf.mxu0  ;;  %v616_v35 = vpop.f32.mrf.mxu1 }
 0x155   : > { %v617_v61 = vadd.f32 %v616_v35, %v503_v34 }
 0x156   : > { %v1119_v36 = vpop.f32.mrf.mxu0  ;;  %v1143_v37 = vpop.f32.mrf.mxu1 }
 0x157   : > { %v638_v45 = vadd.f32 %v1143_v37, %v1119_v36 }
 0x158   : > { %v516_v38 = vpop.f32.mrf.mxu0  ;;  %v629_v39 = vpop.f32.mrf.mxu1 }
 0x159   : > { %v630_v50 = vadd.f32 %v629_v39, %v516_v38 }
 0x15a   : > { %v1120_v40 = vpop.f32.mrf.mxu0  ;;  %v1144_v41 = vpop.f32.mrf.mxu1 }
 0x15b   : > { %v641_v54 = vadd.f32 %v1144_v41, %v1120_v40 }
 0x15c   : > { %v519_v42 = vpop.f32.mrf.mxu0  ;;  %v632_v43 = vpop.f32.mrf.mxu1 }
 0x15d   : > { %v633_v62 = vadd.f32 %v632_v43, %v519_v42 }
 0x16e   : > { %v1163_v46 = vpop.f32.mrf.mxu0  ;;  %v1167_v48 = vpop.f32.mrf.mxu1 }
 0x16f   : > { %v776_v51 = vadd.f32 %v1163_v46, %v622_v44  ;;  %v780_v52 = vadd.f32 %v1167_v48, %v638_v45 }
 0x170   : > { %v743_v55 = vpop.f32.mrf.mxu0  ;;  %v759_v56 = vpop.f32.mrf.mxu1 }
 0x171   : > { %v785_v57 = vadd.f32 %v782_v47, %v776_v51  ;;  %v789_v58 = vadd.f32 %v782_v47, %v780_v52  ;;  %v774_v59 = vadd.f32 %v743_v55, %v614_v49  ;;  %v778_v60 = vadd.f32 %v759_v56, %v630_v50 }
 0x172   : > { %v1164_v63 = vpop.f32.mrf.mxu0  ;;  %v1168_v0 = vpop.f32.mrf.mxu1 }
 0x173   : > { %868 = vst [vmem:[%s1445_s20 + $0x20] sm:$0xff] %v785_v57  ;;  %872 = vst [vmem:[%s1445_s20 + $0x60] sm:$0xff] %v789_v58  ;;  %v783_v1 = vadd.f32 %v782_v47, %v774_v59  ;;  %v787_v2 = vadd.f32 %v782_v47, %v778_v60  ;;  %v777_v3 = vadd.f32 %v1164_v63, %v625_v53 }
 0x174   : > { %v781_v4 = vadd.f32 %v1168_v0, %v641_v54  ;;  %v746_v5 = vpop.f32.mrf.mxu0  ;;  %v762_v6 = vpop.f32.mrf.mxu1 }
 0x175   : > { %866 = vst [vmem:[%s1445_s20] sm:$0xff] %v783_v1  ;;  %870 = vst [vmem:[%s1445_s20 + $0x40] sm:$0xff] %v787_v2  ;;  %v786_v7 = vadd.f32 %v782_v47, %v777_v3  ;;  %v775_v9 = vadd.f32 %v746_v5, %v617_v61  ;;  %v779_v10 = vadd.f32 %v762_v6, %v633_v62 }
 0x176   : > { %v790_v8 = vadd.f32 %v782_v47, %v781_v4 }
 0x177   : > { %869 = vst [vmem:[%s1445_s20 + $0x30] sm:$0xff] %v786_v7  ;;  %v784_v11 = vadd.f32 %v782_v47, %v775_v9  ;;  %v788_v12 = vadd.f32 %v782_v47, %v779_v10 }
 0x178   : > { %873 = vst [vmem:[%s1445_s20 + $0x70] sm:$0xff] %v790_v8 }
 0x179   : > { %867 = vst [vmem:[%s1445_s20 + $0x10] sm:$0xff] %v784_v11  ;;  %871 = vst [vmem:[%s1445_s20 + $0x50] sm:$0xff] %v788_v12 }
 0x17a PF: > { %s16_s21 = sadd.s32 1, %s1224_s21  }
 0x17b   : > { %p13_p5 = scmp.ge.s32.totalorder %s16_s21, 4  }
 0x17d   :  { %15 = sbr.rel (!%p13_p5) target bundleno = 1 (0x1), region = 79 }

</bundles_post_ra>
